<compile_context>
chip_gen: v7x
topology: tpu7x:2x2x1
jax: 0.10.0
libtpu: 0.0.40
codegen_flags: <defaults>
</compile_context>

<pallas_src>
import functools
import math

import jax
import jax.numpy as jnp
from jax import lax
from jax.experimental import pallas as pl
from jax.experimental.pallas import tpu as pltpu


# --------------------------------------------------------------------------------------
# Kernel 1 (fused): logits = x @ w_t ; gates = softmax ; mask1 = one-hot(argmax) ;
#                   per-tile partial sums of gates / mask1 columns (for l_aux / exp_counts)
# --------------------------------------------------------------------------------------
def _gate_fused_kernel(x_ref, wt_ref, gates_ref, mask1_ref, gsum_ref, msum_ref, *, num_tokens):
    i = pl.program_id(0)
    tile_t = x_ref.shape[0]

    # torch parity: input.float() before the fp32 gating Linear.
    # TODO(synk): if activations arrive as bf16 and bit-parity is not required, feed bf16
    # straight to the MXU (preferred_element_type=f32) to halve the dominant HBM read of x.
    x = x_ref[...].astype(jnp.float32)                                   # (tile_t, D)
    wt = wt_ref[...].astype(jnp.float32)                                 # (D, E)
    logits = jnp.dot(x, wt, preferred_element_type=jnp.float32)          # (tile_t, E)

    # softmax(dim=1); the single cross-lane max is reused for the argmax one-hot below.
    m = jnp.max(logits, axis=-1, keepdims=True)
    e = jnp.exp(logits - m)
    denom = jnp.sum(e, axis=-1, keepdims=True)
    gates = e * pl.reciprocal(denom, approx=False)   # approx=True is a speed knob (EUP slot)
    gates_ref[...] = gates

    # one-hot(argmax(gates)) == one-hot(argmax(logits)) (softmax is monotone) — reuse `m`.
    E = logits.shape[-1]
    eids = lax.broadcasted_iota(jnp.int32, logits.shape, 1)
    first_idx = jnp.min(jnp.where(logits >= m, eids, E), axis=-1, keepdims=True)
    mask1 = (eids == first_idx).astype(jnp.float32)
    mask1_ref[...] = mask1

    # Per-tile partial column sums for l_aux / exp_counts, padded rows masked out.
    # Emitted as (1, 8, E) blocks (sublane-aligned) so the grid axis has no accumulator and
    # can stay fully 'parallel' (v7x megacore friendly).
    rows = lax.broadcasted_iota(jnp.int32, (tile_t, 1), 0) + i * tile_t
    valid = (rows < num_tokens).astype(jnp.float32)
    gsum = jnp.sum(gates * valid, axis=0, keepdims=True)                  # (1, E)
    msum = jnp.sum(mask1 * valid, axis=0, keepdims=True)                  # (1, E)
    gsum_ref[...] = jnp.broadcast_to(gsum, (8, E))[None]
    msum_ref[...] = jnp.broadcast_to(msum, (8, E))[None]


def gate_softmax_fused(x_p, w_t, *, tile_t, num_tokens):
    Tp, D = x_p.shape
    E = w_t.shape[1]
    ntiles = Tp // tile_t
    kernel = functools.partial(_gate_fused_kernel, num_tokens=num_tokens)
    out_shapes = (
        jax.ShapeDtypeStruct((Tp, E), jnp.float32),        # gates
        jax.ShapeDtypeStruct((Tp, E), jnp.float32),        # mask1 (one-hot argmax)
        jax.ShapeDtypeStruct((ntiles, 8, E), jnp.float32), # per-tile sum(gates, 0)
        jax.ShapeDtypeStruct((ntiles, 8, E), jnp.float32), # per-tile sum(mask1, 0)
    )
    # TODO(synk): output last dim is E (=8 here) < 128 lanes -> masked partial stores; a
    # lane-dense (E, tile_t) layout would fix it but the downstream glue expects (T, E).
    return pl.pallas_call(
        kernel,
        out_shape=out_shapes,
        grid_spec=pltpu.PrefetchScalarGridSpec(
            num_scalar_prefetch=0,
            grid=(ntiles,),
            in_specs=[
                pl.BlockSpec((tile_t, D), lambda i: (i, 0)),
                pl.BlockSpec((D, E), lambda i: (0, 0)),
            ],
            out_specs=[
                pl.BlockSpec((tile_t, E), lambda i: (i, 0)),
                pl.BlockSpec((tile_t, E), lambda i: (i, 0)),
                pl.BlockSpec((1, 8, E), lambda i: (i, 0, 0)),
                pl.BlockSpec((1, 8, E), lambda i: (i, 0, 0)),
            ],
        ),
        compiler_params=pltpu.CompilerParams(dimension_semantics=("parallel",)),
    )(x_p, w_t)


# --------------------------------------------------------------------------------------
# Kernel 2: combine_weights = gates * final_mask   (pure elementwise, fully parallel)
# --------------------------------------------------------------------------------------
def _combine_kernel(gates_ref, mask_ref, cw_ref):
    cw_ref[...] = gates_ref[...] * mask_ref[...]


def combine_weights_call(gates_p, mask_p, *, tile_t):
    Tp, E = gates_p.shape
    return pl.pallas_call(
        _combine_kernel,
        out_shape=jax.ShapeDtypeStruct((Tp, E), jnp.float32),
        grid_spec=pltpu.PrefetchScalarGridSpec(
            num_scalar_prefetch=0,
            grid=(Tp // tile_t,),
            in_specs=[
                pl.BlockSpec((tile_t, E), lambda i: (i, 0)),
                pl.BlockSpec((tile_t, E), lambda i: (i, 0)),
            ],
            out_specs=pl.BlockSpec((tile_t, E), lambda i: (i, 0)),
        ),
        compiler_params=pltpu.CompilerParams(dimension_semantics=("parallel",)),
    )(gates_p, mask_p)


# --------------------------------------------------------------------------------------
# Tile sizing: as big as possible (amortize ~0.35 us/grid-step) while the double-buffered
# x tile stays inside the smallest default scoped-VMEM budget (v5e: 16 MiB, keep headroom).
# --------------------------------------------------------------------------------------
def _pick_tile(T, D, max_tile=512):
    budget = 12 * 1024 * 1024                       # headroom under the 16 MiB v5e default
    cap = min(max_tile, max(8, budget // (2 * D * 4)))
    cap = max(8, (cap // 8) * 8)
    t8 = ((T + 7) // 8) * 8                         # whole problem in one tile if it fits
    return min(cap, t8)


# --------------------------------------------------------------------------------------
# Plain-JAX glue: data-dependent selection part of main_thresholdGating.
# --------------------------------------------------------------------------------------
def _threshold_glue(gates, mask1, capacity, threshold):
    T, E = gates.shape
    gates_sorted, gates_indices = lax.top_k(gates, E)        # sorted descending, (T, E)
    top1_p = gates_sorted[:, 0]
    cum = jnp.cumsum(gates_sorted, axis=-1)
    chosen = (cum - gates_sorted) < threshold
    chosen = chosen.at[:, 0].set(True)
    whole_idx = jnp.where(chosen, gates_indices + 1, 0)      # 0 = "not chosen" dummy slot

    # TODO(synk): torch truncates all-zero trailing columns (explore_top_k_num) — a
    # data-dependent shape. Keeping all E columns only writes into the dummy expert column 0
    # (dropped below) and shifts every importance rank by the same constant, so the selected
    # tokens are identical.
    rank = jnp.arange(E, 0, -1, dtype=jnp.float32)
    scatter_importance = rank[None, :] + gates_sorted        # (T, E)

    rows = jnp.arange(T)[:, None]
    tensor_all_mask = (jnp.zeros((T, E + 1), jnp.float32)
                       .at[rows, whole_idx].max(scatter_importance))[:, 1:]   # (T, E)

    each_token_want = jnp.sum(whole_idx > 0, axis=1)
    expert_received = jnp.sum(tensor_all_mask > 0, axis=0)
    receive_ratio = expert_received * 100.0 / T

    # per-expert capacity selection: top-`capacity` tokens by importance
    _, top_idx_t = lax.top_k(tensor_all_mask.T, capacity)    # (E, cap)
    top_idx = top_idx_t.T                                    # (cap, E)
    keep = jnp.zeros((T, E), jnp.float32).at[top_idx, jnp.arange(E)[None, :]].set(1.0)
    final_mask = ((tensor_all_mask * keep) > 0).astype(jnp.float32)

    token_chosen = jnp.sum(final_mask, axis=-1)
    info = dict(
        want_num=jnp.mean(each_token_want.astype(jnp.float32)),
        receive_ratio=receive_ratio,
        chosen_num=jnp.sum(token_chosen) / T,
        token_not_full_ratio=jnp.sum(token_chosen < each_token_want) / T,
        expert_not_full_ratio=jnp.sum(jnp.sum(final_mask, axis=0) < capacity) / E,
        drop_rate=(T - jnp.sum(mask1 * final_mask)) * 100.0 / T,
    )
    return final_mask, top_idx, top1_p, info


# --------------------------------------------------------------------------------------
# TopKGate.forward (eval mode, moe_type='threshold', in_logits=None, view_num=1)
# --------------------------------------------------------------------------------------
def topk_gate_forward(x, w_t, *, capacity_factor=1.0, min_capacity=8,
                      threshold=-1.0, max_tile=512):
    T, D = x.shape
    E = w_t.shape[1]

    tile_t = _pick_tile(T, D, max_tile)
    Tp = ((T + tile_t - 1) // tile_t) * tile_t
    x_p = x if Tp == T else jnp.pad(x, ((0, Tp - T), (0, 0)))

    gates_p, mask1_p, gsum_p, msum_p = gate_softmax_fused(x_p, w_t, tile_t=tile_t, num_tokens=T)
    gates = gates_p[:T]
    mask1 = mask1_p[:T]

    # l_aux = sum(mean(gates,0) * mean(mask1,0)) * E  from the fused per-tile partial sums
    gates_sum = jnp.sum(gsum_p[:, 0, :], axis=0)     # (E,)
    mask1_sum = jnp.sum(msum_p[:, 0, :], axis=0)     # (E,)
    me = gates_sum / T
    ce = mask1_sum / T
    l_aux = jnp.sum(me * ce) * E

    capacity = int(math.ceil(T / E * capacity_factor))
    if capacity < min_capacity:
        capacity = int(min_capacity)

    final_mask, top_idx, top1_p, info = _threshold_glue(gates, mask1, capacity, threshold)

    mask_p = final_mask if Tp == T else jnp.pad(final_mask, ((0, Tp - T), (0, 0)))
    combine_weights = combine_weights_call(gates_p, mask_p, tile_t=tile_t)[:T]

    exp_counts = mask1_sum.astype(jnp.int32)
    gate_info = {
        'top1_p': top1_p,
        'top1_p_mean': jnp.mean(top1_p),
        'balance_coe': jnp.std(mask1_sum) / (T / E),
        **info,
    }
    dispatch_mask = None
    return l_aux, combine_weights, dispatch_mask, exp_counts, gate_info, top_idx


# --------------------------------------------------------------------------------------
# Pure-JAX reference (no Pallas) for a correctness check.
# --------------------------------------------------------------------------------------
def _ref_forward(x, w_t, *, capacity_factor, min_capacity, threshold):
    logits = x.astype(jnp.float32) @ w_t.astype(jnp.float32)
    gates = jax.nn.softmax(logits, axis=-1)
    T, E = gates.shape
    mask1 = jax.nn.one_hot(jnp.argmax(gates, axis=-1), E, dtype=jnp.float32)
    capacity = max(int(math.ceil(T / E * capacity_factor)), int(min_capacity))
    final_mask, _, _, _ = _threshold_glue(gates, mask1, capacity, threshold)
    combine_weights = gates * final_mask
    l_aux = jnp.sum(jnp.mean(gates, axis=0) * jnp.mean(mask1, axis=0)) * E
    exp_counts = jnp.sum(mask1, axis=0).astype(jnp.int32)
    return l_aux, combine_weights, exp_counts


if __name__ == "__main__":
    model_dim, num_experts, num_tokens = 32, 8, 64
    threshold = 0.5          # TopKGate(..., threshold=0.5) so the threshold path picks >1 expert
    capacity_factor = 1.0    # eval_capacity_factor
    min_capacity = 8

    key = jax.random.PRNGKey(0)
    k_x, k_w = jax.random.split(key)
    x = jax.random.normal(k_x, (num_tokens, model_dim), jnp.float32)
    # deterministic stand-in for torch.nn.Linear(model_dim, num_experts, bias=False) weight
    bound = 1.0 / math.sqrt(model_dim)
    w = jax.random.uniform(k_w, (num_experts, model_dim), jnp.float32, -bound, bound)
    w_t = w.T   # (model_dim, num_experts)

    out = topk_gate_forward(x, w_t, capacity_factor=capacity_factor,
                            min_capacity=min_capacity, threshold=threshold)
    l_aux, combine_weights, dispatch_mask, exp_counts, gate_info, top_idx = out
    jax.block_until_ready(combine_weights)
    jax.block_until_ready(l_aux)
    jax.block_until_ready(exp_counts)

    ref_l_aux, ref_cw, ref_counts = _ref_forward(
        x, w_t, capacity_factor=capacity_factor,
        min_capacity=min_capacity, threshold=threshold)

    assert combine_weights.shape == (num_tokens, num_experts)
    assert jnp.allclose(combine_weights, ref_cw, atol=1e-5, rtol=1e-5)
    assert jnp.allclose(l_aux, ref_l_aux, atol=1e-6, rtol=1e-5)
    assert jnp.array_equal(exp_counts, ref_counts)

    print("KERNEL_OK")
</pallas_src>

<mosaic_0001>
module attributes {stable_mosaic.version = 11 : i64} {
  func.func @_gate_fused_kernel(%arg0: i32, %arg1: memref<64x32xf32, #tpu.memory_space<vmem>>, %arg2: memref<32x8xf32, #tpu.memory_space<vmem>>, %arg3: memref<64x8xf32, #tpu.memory_space<vmem>>, %arg4: memref<64x8xf32, #tpu.memory_space<vmem>>, %arg5: memref<1x8x8xf32, #tpu.memory_space<vmem>>, %arg6: memref<1x8x8xf32, #tpu.memory_space<vmem>>) attributes {dimension_semantics = [#tpu.dimension_semantics<parallel>], iteration_bounds = array<i64: 1>, scalar_prefetch = 0 : i64, scratch_operands = 0 : i64, tpu.core_type = #tpu.core_type<tc>, window_params = [{transform_indices = @transform_0, window_bounds = array<i64: 64, 32>}, {pipeline_mode = #tpu.pipeline_mode<synchronous>, transform_indices = @transform_1, window_bounds = array<i64: 32, 8>}, {transform_indices = @transform_2, window_bounds = array<i64: 64, 8>}, {transform_indices = @transform_3, window_bounds = array<i64: 64, 8>}, {transform_indices = @transform_4, window_bounds = array<i64: 1, 8, 8>}, {transform_indices = @transform_5, window_bounds = array<i64: 1, 8, 8>}]} {
    %c0 = arith.constant 0 : index
    %c0_0 = arith.constant 0 : index
    %0 = vector.load %arg1[%c0, %c0_0] : memref<64x32xf32, #tpu.memory_space<vmem>>, vector<64x32xf32>
    %c0_1 = arith.constant 0 : index
    %c0_2 = arith.constant 0 : index
    %1 = vector.load %arg2[%c0_1, %c0_2] : memref<32x8xf32, #tpu.memory_space<vmem>>, vector<32x8xf32>
    %cst = arith.constant dense<0.000000e+00> : vector<64x8xf32>
    %2 = tpu.matmul %0, %1, %cst {dimension_numbers = #tpu.dot_dimension_numbers<[1], [0], [0], [1], [0, 0, 1, 1], [], []>} : vector<64x32xf32>, vector<32x8xf32>, vector<64x8xf32> -> vector<64x8xf32>
    %cst_3 = arith.constant dense<0xFF800000> : vector<64xf32>
    %3 = vector.multi_reduction <maximumf>, %2, %cst_3 [1] : vector<64x8xf32> to vector<64xf32>
    %4 = vector.shape_cast %3 : vector<64xf32> to vector<64x1xf32>
    %5 = vector.broadcast %4 : vector<64x1xf32> to vector<64x8xf32>
    %6 = arith.subf %2, %5 : vector<64x8xf32>
    %7 = math.exp %6 : vector<64x8xf32>
    %cst_4 = arith.constant dense<0.000000e+00> : vector<64xf32>
    %8 = vector.multi_reduction <add>, %7, %cst_4 [1] : vector<64x8xf32> to vector<64xf32>
    %9 = vector.shape_cast %8 : vector<64xf32> to vector<64x1xf32>
    %10 = tpu.reciprocal %9 : vector<64x1xf32> -> vector<64x1xf32>
    %11 = vector.broadcast %10 : vector<64x1xf32> to vector<64x8xf32>
    %12 = arith.mulf %7, %11 : vector<64x8xf32>
    %c0_5 = arith.constant 0 : index
    %c0_6 = arith.constant 0 : index
    %13 = vector.load %arg3[%c0_5, %c0_6] : memref<64x8xf32, #tpu.memory_space<vmem>>, vector<64x8xf32>
    tpu.vector_store %arg3[%c0_5, %c0_6], %12 {strides = array<i32>} : memref<64x8xf32, #tpu.memory_space<vmem>>, vector<64x8xf32>,
    %14 = tpu.iota {dimensions = array<i32: 1>} : vector<64x8xi32>
    %15 = vector.broadcast %4 : vector<64x1xf32> to vector<64x8xf32>
    %16 = arith.cmpf oge, %2, %15 : vector<64x8xf32>
    %c8_i32 = arith.constant 8 : i32
    %17 = vector.broadcast %c8_i32 : i32 to vector<64x8xi32>
    %18 = arith.select %16, %14, %17 : vector<64x8xi1>, vector<64x8xi32>
    %cst_7 = arith.constant dense<2147483647> : vector<64xi32>
    %19 = vector.multi_reduction <minsi>, %18, %cst_7 [1] : vector<64x8xi32> to vector<64xi32>
    %20 = vector.shape_cast %19 : vector<64xi32> to vector<64x1xi32>
    %21 = vector.broadcast %20 : vector<64x1xi32> to vector<64x8xi32>
    %22 = arith.cmpi eq, %14, %21 : vector<64x8xi32>
    %23 = arith.extui %22 : vector<64x8xi1> to vector<64x8xi32>
    %24 = arith.sitofp %23 : vector<64x8xi32> to vector<64x8xf32>
    %c0_8 = arith.constant 0 : index
    %c0_9 = arith.constant 0 : index
    %25 = vector.load %arg4[%c0_8, %c0_9] : memref<64x8xf32, #tpu.memory_space<vmem>>, vector<64x8xf32>
    tpu.vector_store %arg4[%c0_8, %c0_9], %24 {strides = array<i32>} : memref<64x8xf32, #tpu.memory_space<vmem>>, vector<64x8xf32>,
    %26 = tpu.iota {dimensions = array<i32: 0>} : vector<64x1xi32>
    %c64_i32 = arith.constant 64 : i32
    %27 = arith.muli %arg0, %c64_i32 : i32
    %28 = vector.broadcast %27 : i32 to vector<64x1xi32>
    %29 = arith.addi %26, %28 : vector<64x1xi32>
    %c64_i32_10 = arith.constant 64 : i32
    %30 = vector.broadcast %c64_i32_10 : i32 to vector<64x1xi32>
    %31 = arith.cmpi slt, %29, %30 : vector<64x1xi32>
    %32 = arith.extui %31 : vector<64x1xi1> to vector<64x1xi32>
    %33 = arith.sitofp %32 : vector<64x1xi32> to vector<64x1xf32>
    %34 = vector.broadcast %33 : vector<64x1xf32> to vector<64x8xf32>
    %35 = arith.mulf %12, %34 : vector<64x8xf32>
    %cst_11 = arith.constant dense<0.000000e+00> : vector<8xf32>
    %36 = vector.multi_reduction <add>, %35, %cst_11 [0] : vector<64x8xf32> to vector<8xf32>
    %37 = vector.shape_cast %36 : vector<8xf32> to vector<1x8xf32>
    %38 = vector.broadcast %33 : vector<64x1xf32> to vector<64x8xf32>
    %39 = arith.mulf %24, %38 : vector<64x8xf32>
    %cst_12 = arith.constant dense<0.000000e+00> : vector<8xf32>
    %40 = vector.multi_reduction <add>, %39, %cst_12 [0] : vector<64x8xf32> to vector<8xf32>
    %41 = vector.shape_cast %40 : vector<8xf32> to vector<1x8xf32>
    %42 = vector.shape_cast %37 : vector<1x8xf32> to vector<1x8xf32>
    %43 = vector.broadcast %42 : vector<1x8xf32> to vector<8x8xf32>
    %44 = vector.shape_cast %43 : vector<8x8xf32> to vector<1x8x8xf32>
    %c0_13 = arith.constant 0 : index
    %c0_14 = arith.constant 0 : index
    %c0_15 = arith.constant 0 : index
    %45 = vector.load %arg5[%c0_13, %c0_14, %c0_15] : memref<1x8x8xf32, #tpu.memory_space<vmem>>, vector<1x8x8xf32>
    tpu.vector_store %arg5[%c0_13, %c0_14, %c0_15], %44 {strides = array<i32>} : memref<1x8x8xf32, #tpu.memory_space<vmem>>, vector<1x8x8xf32>,
    %46 = vector.shape_cast %41 : vector<1x8xf32> to vector<1x8xf32>
    %47 = vector.broadcast %46 : vector<1x8xf32> to vector<8x8xf32>
    %48 = vector.shape_cast %47 : vector<8x8xf32> to vector<1x8x8xf32>
    %c0_16 = arith.constant 0 : index
    %c0_17 = arith.constant 0 : index
    %c0_18 = arith.constant 0 : index
    %49 = vector.load %arg6[%c0_16, %c0_17, %c0_18] : memref<1x8x8xf32, #tpu.memory_space<vmem>>, vector<1x8x8xf32>
    tpu.vector_store %arg6[%c0_16, %c0_17, %c0_18], %48 {strides = array<i32>} : memref<1x8x8xf32, #tpu.memory_space<vmem>>, vector<1x8x8xf32>,
    return
  }
  func.func @transform_0(%arg0: i32) -> (i32, i32) {
    %c0_i32 = arith.constant 0 : i32
    %c0_i32_0 = arith.constant 0 : i32
    return %arg0, %c0_i32 : i32, i32
  }
  func.func @transform_1(%arg0: i32) -> (i32, i32) {
    %c0_i32 = arith.constant 0 : i32
    %c0_i32_0 = arith.constant 0 : i32
    %c0_i32_1 = arith.constant 0 : i32
    return %c0_i32, %c0_i32_0 : i32, i32
  }
  func.func @transform_2(%arg0: i32) -> (i32, i32) {
    %c0_i32 = arith.constant 0 : i32
    %c0_i32_0 = arith.constant 0 : i32
    return %arg0, %c0_i32 : i32, i32
  }
  func.func @transform_3(%arg0: i32) -> (i32, i32) {
    %c0_i32 = arith.constant 0 : i32
    %c0_i32_0 = arith.constant 0 : i32
    return %arg0, %c0_i32 : i32, i32
  }
  func.func @transform_4(%arg0: i32) -> (i32, i32, i32) {
    %c0_i32 = arith.constant 0 : i32
    %c0_i32_0 = arith.constant 0 : i32
    %c0_i32_1 = arith.constant 0 : i32
    return %arg0, %c0_i32, %c0_i32_0 : i32, i32, i32
  }
  func.func @transform_5(%arg0: i32) -> (i32, i32, i32) {
    %c0_i32 = arith.constant 0 : i32
    %c0_i32_0 = arith.constant 0 : i32
    %c0_i32_1 = arith.constant 0 : i32
    return %arg0, %c0_i32, %c0_i32_0 : i32, i32, i32
  }
}

</mosaic_0001>

<bundles_post_ra>
// kernel: tpu_custom_call.1
= control target key start
LH: loop header
LB: loop body
LE: loop exit
PB: predicated region body
PF: predicated region fallthrough
CT: control target
= control target key end

     0   :  { %11 = vsyncpa [#allocation3], 0  ;;  %vm29_vm0 = vcmask 261120   ;;  %s1089_s0 = inlined_call_operand.vmem [shape: f32[64,32], index: 0, kind: input, shape index: {}]   ;;  %s1090_s1 = inlined_call_operand.vmem [shape: f32[32,8], index: 1, kind: input, shape index: {}]   ;;  %s1091_s2 = inlined_call_operand.vmem [shape: f32[64,8], index: 2, kind: output, shape index: {0}]   ;;  %s1092_s3 = inlined_call_operand.vmem [shape: f32[64,8], index: 3, kind: output, shape index: {1}]   ;;  %s1093_s4 = inlined_call_operand.hbm [shape: f32[1,8,8], index: 4, kind: output, shape index: {2}]   ;;  %s1094_s5 = inlined_call_operand.hbm [shape: f32[1,8,8], index: 5, kind: output, shape index: {3}]  }
   0x1   :  { %v25_v0 = vld [vmem:[%s1090_s1] sm:$0xff]  ;;  %v26_v1 = vld [vmem:[%s1090_s1 + $0x8] sm:$0xff]  ;;  %v27_v2 = vld [vmem:[%s1090_s1 + $0x10] sm:$0xff] }
   0x2   :  { %v613_v3 = vpack.c.bf16 %v26_v1, %v25_v0  ;;  %v28_v4 = vld [vmem:[%s1090_s1 + $0x18] sm:$0xff]  ;;  %v17_v5 = vld [vmem:[%s1089_s0] sm:$0xff] }
   0x3   :  { %v617_v6 = vpack.c.bf16 %v28_v4, %v27_v2  ;;  %601 = vmatprep.mubr.msk.f32.mxu0 %vm29_vm0, %v17_v5  ;;  %v21_v7 = vld [vmem:[%s1089_s0 + $0x20] sm:$0xff] }
   0x4   :  { %614 = vmatprep.subr.bf16.mxu0 %v613_v3  ;;  %621 = vmatprep.subr.bf16.mxu1 %v613_v3 }
   0x5   :  { %616 = vmatpush3.bf16.msra.mxu0 %v613_v3  ;;  %623 = vmatpush3.bf16.msra.mxu1 %v613_v3 }
   0x6   :  { %12 = vsyncpa [#allocation5], 0  ;;  %618 = vmatprep.subr.bf16.mxu0 %v617_v6  ;;  %622 = vmatprep.subr.bf16.mxu1 %v617_v6  ;;  %v18_v8 = vld [vmem:[%s1089_s0 + $0x8] sm:$0xff]  ;;  %v19_v10 = vld [vmem:[%s1089_s0 + $0x10] sm:$0xff]  ;;  %vm159_vm1 = vcmask 64512   ;;  %v256_v30 = vlaneseq  ;;  %s709_s17 = smov [#allocation2]  }
   0x7   :  { %607 = vmatprep.mubr.msk.f32.mxu1 %vm29_vm0, %v21_v7  ;;  %v22_v9 = vld [vmem:[%s1089_s0 + $0x28] sm:$0xff]  ;;  %v23_v11 = vld [vmem:[%s1089_s0 + $0x30] sm:$0xff]  ;;  %v20_v12 = vld [vmem:[%s1089_s0 + $0x18] sm:$0xff]  ;;  %s539_s18 = sshll.u32 %s709_s17, 4  ;;  %s540_s18 = int_to_ptr.vmem [resolvable:$true] %s539_s18 }
   0x8   :  { %v24_v13 = vld [vmem:[%s1089_s0 + $0x38] sm:$0xff]  ;;  %v805_v31 = vand.u32 127, %v256_v30  ;;  %s660_s21 = scalar_lea.vmem %s540_s18, 128  ;;  %p665_p1 = scmp.lt.s32.totalorder %s540_s18, %s540_s18 }
   0x9   :  { %620 = vmatpush3.bf16.msra.mxu0 %v617_v6  ;;  %624 = vmatpush3.bf16.msra.mxu1 %v617_v6  ;;  %p661_p0 = scmp.ne.s32.totalorder %s540_s18, %s660_s21  ;;  %p666_p2 = scmp.lt.s32.totalorder %s660_s21, %s660_s21 }
   0xb   :  { %p667_p3 = por %p666_p2, %p665_p1 }
   0xc   :  { %602 = vmatmul.mubr.msk.f32.vlgmr.msra.gmra.mrb[0].mxu0 %vm29_vm0, %v18_v8  ;;  %608 = vmatmul.mubr.msk.f32.vlgmr.msra.gmra.mrb[0].mxu1 %vm29_vm0, %v22_v9 }
   0xd   :  { %604 = vmatprep.mubr.msk.f32.mxu0 %vm29_vm0, %v19_v10  ;;  %610 = vmatprep.mubr.msk.f32.mxu1 %vm29_vm0, %v23_v11  ;;  %p668_p4 = pnand %p667_p3, %p661_p0 }
  0x10   :  { %605 = vmatmul.mubr.msk.f32.gmra.mrb[2].mxu0 %vm29_vm0, %v20_v12  ;;  %611 = vmatmul.mubr.msk.f32.gmra.mrb[2].mxu1 %vm29_vm0, %v24_v13 }
  0xdf   :  { %v603_v14 = vpop.f32.mrb[0].mxu0  ;;  %v785_v15 = vpop.f32.mrb[0].mxu1 }
  0xe0   :  { %v120_v16 = vpop.f32.mrb[1].mxu0  ;;  %v140_v17 = vpop.f32.mrb[1].mxu1  ;;  %v163_v23 = vsel %vm159_vm1, %v603_v14, -inf  ;;  %v175_v28 = vsel %vm159_vm1, %v785_v15, -inf }
  0xe1   :  { %v160_v18 = vsel %vm159_vm1, %v120_v16, -inf  ;;  %v172_v25 = vsel %vm159_vm1, %v140_v17, -inf }
  0xe2   :  { %161 = vmax.xlane.f32.xlu0 %v160_v18 }
  0xe3   :  { %v788_v19 = vpop.f32.mrb[2].mxu0  ;;  %v790_v20 = vpop.f32.mrb[2].mxu1 }
  0xe4   :  { %v130_v21 = vpop.f32.mrb[3].mxu0  ;;  %v792_v22 = vpop.f32.mrb[3].mxu1  ;;  %v169_v26 = vsel %vm159_vm1, %v788_v19, -inf  ;;  %v181_v29 = vsel %vm159_vm1, %v790_v20, -inf }
  0xe5   :  { %v166_v24 = vsel %vm159_vm1, %v130_v21, -inf  ;;  %v178_v27 = vsel %vm159_vm1, %v792_v22, -inf }
  0xe6   :  { %164 = vmax.xlane.f32.xlu0 %v163_v23  ;;  %167 = vmax.xlane.f32.xlu1 %v166_v24 }
  0xea   :  { %173 = vmax.xlane.f32.xlu0 %v172_v25  ;;  %170 = vmax.xlane.f32.xlu1 %v169_v26 }
  0xee   :  { %179 = vmax.xlane.f32.xlu0 %v178_v27  ;;  %176 = vmax.xlane.f32.xlu1 %v175_v28 }
  0xf2   :  { %182 = vmax.xlane.f32.xlu1 %v181_v29 }
 0x16f   :  { %v162_v32 = vpop.xlane.xlu0 %161 }
 0x170   :  { %vm258_vm2 = vcmp.ge.f32.partialorder %v120_v16, %v162_v32  ;;  %v184_v38 = vsub.f32 %v120_v16, %v162_v32 }
 0x171   :  { %v266_v33 = vsel %vm258_vm2, %v805_v31, 8 }
 0x172   :  { %v809_v34 = vsel %vm159_vm1, %v266_v33, 2147483647  ;;  %v192_v47 = vmul.f32 1.442695, %v184_v38 }
 0x173   :  { %v165_v35 = vpop.xlane.xlu0 %164  ;;  %v168_v36 = vpop.xlane.xlu1 %167  ;;  %v276_v37 = vshra.s32 %v809_v34, 16 }
 0x174   :  { %vm259_vm3 = vcmp.ge.f32.partialorder %v603_v14, %v165_v35  ;;  %vm260_vm4 = vcmp.ge.f32.partialorder %v130_v21, %v168_v36  ;;  %v185_v42 = vsub.f32 %v603_v14, %v165_v35  ;;  %v186_v51 = vsub.f32 %v130_v21, %v168_v36 }
 0x175   :  { %v267_v39 = vsel %vm259_vm3, %v805_v31, 8  ;;  %v813_v40 = vcvt.s32.f32 %v276_v37  ;;  %v268_v41 = vsel %vm260_vm4, %v805_v31, 8  ;;  %628 = vpow2.f32 %v192_v47 }
 0x176   :  { %v818_v45 = vsel %vm159_vm1, %v267_v39, 2147483647  ;;  %v821_v46 = vsel %vm159_vm1, %v268_v41, 2147483647  ;;  %v194_v54 = vmul.f32 1.442695, %v185_v42 }
 0x177   :  { %279 = vmin.xlane.f32.xlu0 %v813_v40  ;;  %v174_v43 = vpop.xlane.xlu0 %173  ;;  %v171_v44 = vpop.xlane.xlu1 %170  ;;  %v291_v50 = vshra.s32 %v818_v45, 16  ;;  %v306_v53 = vshra.s32 %v821_v46, 16  ;;  %v196_v0 = vmul.f32 1.442695, %v186_v51  ;;  %v275_v42 = vand.u32 65535, %v809_v34 }
 0x178   :  { %v188_v48 = vsub.f32 %v140_v17, %v174_v43  ;;  %vm262_vm5 = vcmp.ge.f32.partialorder %v140_v17, %v174_v43  ;;  %vm261_vm6 = vcmp.ge.f32.partialorder %v788_v19, %v171_v44  ;;  %630 = vpow2.f32 %v194_v54 }
 0x179   :  { %v270_v49 = vsel %vm262_vm5, %v805_v31, 8  ;;  %v269_v52 = vsel %vm261_vm6, %v805_v31, 8  ;;  %v828_v56 = vcvt.s32.f32 %v291_v50  ;;  %v837_v61 = vcvt.s32.f32 %v306_v53 }
 0x17a   :  { %v831_v58 = vsel %vm159_vm1, %v270_v49, 2147483647  ;;  %v834_v59 = vsel %vm159_vm1, %v269_v52, 2147483647  ;;  %v200_v60 = vmul.f32 1.442695, %v188_v48  ;;  %v187_v4 = vsub.f32 %v788_v19, %v171_v44 }
 0x17b   :  { %v180_v55 = vpop.xlane.xlu0 %179  ;;  %v177_v57 = vpop.xlane.xlu1 %176  ;;  %294 = vmin.xlane.f32.xlu1 %v828_v56  ;;  %309 = vmin.xlane.f32.xlu0 %v837_v61  ;;  %v336_v2 = vshra.s32 %v831_v58, 16  ;;  %v321_v3 = vshra.s32 %v834_v59, 16  ;;  %v277_v44 = vcvt.s32.f32 %v275_v42  ;;  %v290_v48 = vand.u32 65535, %v818_v45 }
 0x17c   :  { %vm264_vm7 = vcmp.ge.f32.partialorder %v792_v22, %v180_v55  ;;  %v189_v63 = vsub.f32 %v785_v15, %v177_v57  ;;  %vm263_vm8 = vcmp.ge.f32.partialorder %v785_v15, %v177_v57  ;;  %632 = vpow2.f32 %v200_v60 }
 0x17d   :  { %v272_v62 = vsel %vm264_vm7, %v805_v31, 8  ;;  %v271_v1 = vsel %vm263_vm8, %v805_v31, 8  ;;  %v854_v9 = vcvt.s32.f32 %v336_v2  ;;  %v856_v10 = vcvt.s32.f32 %v321_v3 }
 0x17e   :  { %v849_v6 = vsel %vm159_vm1, %v272_v62, 2147483647  ;;  %v852_v7 = vsel %vm159_vm1, %v271_v1, 2147483647  ;;  %v202_v8 = vmul.f32 1.442695, %v189_v63  ;;  %634 = vpow2.f32 %v196_v0 }
 0x17f   :  { %v183_v5 = vpop.xlane.xlu1 %182  ;;  %v366_v11 = vshra.s32 %v849_v6, 16  ;;  %v351_v12 = vshra.s32 %v852_v7, 16  ;;  %339 = vmin.xlane.f32.xlu0 %v854_v9  ;;  %324 = vmin.xlane.f32.xlu1 %v856_v10  ;;  %v198_v17 = vmul.f32 1.442695, %v187_v4  ;;  %v190_v18 = vsub.f32 %v792_v22, %v180_v55  ;;  %v873_v21 = vpop.eup %628 }
 0x180   :  { %vm265_vm9 = vcmp.ge.f32.partialorder %v790_v20, %v183_v5  ;;  %636 = vpow2.f32 %v202_v8  ;;  %v208_v26 = vsel %vm159_vm1, %v873_v21, 0.0  ;;  %v191_v39 = vsub.f32 %v790_v20, %v183_v5 }
 0x181   :  { %v273_v13 = vsel %vm265_vm9, %v805_v31, 8  ;;  %v864_v14 = vcvt.s32.f32 %v366_v11  ;;  %v866_v15 = vcvt.s32.f32 %v351_v12  ;;  %638 = vpow2.f32 %v198_v17 }
 0x182   :  { %v869_v16 = vsel %vm159_vm1, %v273_v13, 2147483647  ;;  %v204_v24 = vmul.f32 1.442695, %v190_v18  ;;  %v879_v25 = vpop.eup %630  ;;  %v206_v41 = vmul.f32 1.442695, %v191_v39  ;;  %v292_v51 = vcvt.s32.f32 %v290_v48 }
 0x183   :  { %v381_v19 = vshra.s32 %v869_v16, 16  ;;  %369 = vmin.xlane.f32.xlu0 %v864_v14  ;;  %354 = vmin.xlane.f32.xlu1 %v866_v15  ;;  %v211_v29 = vsel %vm159_vm1, %v879_v25, 0.0  ;;  %v320_v34 = vand.u32 65535, %v834_v59  ;;  %v305_v55 = vand.u32 65535, %v821_v46 }
 0x184   :  { %640 = vpow2.f32 %v204_v24  ;;  %v350_v57 = vand.u32 65535, %v852_v7  ;;  %v335_v0 = vand.u32 65535, %v831_v58  ;;  %v380_v46 = vand.u32 65535, %v869_v16 }
 0x185   :  { %v877_v23 = vcvt.s32.f32 %v381_v19  ;;  %642 = vpow2.f32 %v206_v41  ;;  %v322_v54 = vcvt.s32.f32 %v320_v34  ;;  %v307_v62 = vcvt.s32.f32 %v305_v55 }
 0x186   :  { %v883_v27 = vpop.eup %632  ;;  %v352_v63 = vcvt.s32.f32 %v350_v57  ;;  %v337_v4 = vcvt.s32.f32 %v335_v0  ;;  %v382_v5 = vcvt.s32.f32 %v380_v46  ;;  %v365_v7 = vand.u32 65535, %v849_v6 }
 0x187   :  { %209 = vadd.xlane.f32.xlu0 %v208_v26  ;;  %384 = vmin.xlane.f32.xlu1 %v877_v23  ;;  %v220_v28 = vsel %vm159_vm1, %v883_v27, 0.0 }
 0x188   :  { %v886_v22 = vpop.eup %634  ;;  %v367_v11 = vcvt.s32.f32 %v365_v7 }
 0x189   :  { %v214_v32 = vsel %vm159_vm1, %v886_v22, 0.0 }
 0x18a   :  { %v892_v30 = vpop.eup %636 }
 0x18b   :  { %221 = vadd.xlane.f32.xlu0 %v220_v28  ;;  %212 = vadd.xlane.f32.xlu1 %v211_v29  ;;  %v223_v33 = vsel %vm159_vm1, %v892_v30, 0.0  ;;  %v898_v35 = vpop.eup %638 }
 0x18c   :  { %v217_v36 = vsel %vm159_vm1, %v898_v35, 0.0 }
 0x18e   :  { %v902_v37 = vpop.eup %640 }
 0x18f   :  { %215 = vadd.xlane.f32.xlu0 %v214_v32  ;;  %224 = vadd.xlane.f32.xlu1 %v223_v33  ;;  %v226_v38 = vsel %vm159_vm1, %v902_v37, 0.0  ;;  %v913_v49 = vpop.eup %642 }
 0x190   :  { %v229_v20 = vsel %vm159_vm1, %v913_v49, 0.0 }
 0x193   :  { %218 = vadd.xlane.f32.xlu1 %v217_v36 }
 0x197   :  { %227 = vadd.xlane.f32.xlu1 %v226_v38 }
 0x204   :  { %v908_v43 = vpop.xlane.xlu0 %279 }
 0x205   :  { %vm281_vm10 = vcmp.eq.f32.partialorder %v813_v40, %v908_v43  ;;  %v286_v34 = vcvt.f32.s32 %v908_v43 }
 0x206   :  { %v282_v47 = vsel %vm281_vm10, %v277_v44, inf }
 0x207   :  { %283 = vmin.xlane.f32.xlu1 %v282_v47 }
 0x208   :  { %v915_v50 = vpop.xlane.xlu1 %294  ;;  %v919_v52 = vpop.xlane.xlu0 %309 }
 0x209   :  { %vm296_vm11 = vcmp.eq.f32.partialorder %v828_v56, %v915_v50  ;;  %vm311_vm13 = vcmp.eq.f32.partialorder %v837_v61, %v919_v52  ;;  %v301_v57 = vcvt.f32.s32 %v915_v50  ;;  %v316_v50 = vcvt.f32.s32 %v919_v52 }
 0x20a   :  { %v297_v40 = vsel %vm296_vm11, %v292_v51, inf  ;;  %v312_v1 = vsel %vm311_vm13, %v307_v62, inf  ;;  %v708_v62 = vmov 0.0  }
 0x20b   :  { %230 = vadd.xlane.f32.xlu1 %v229_v20  ;;  %298 = vmin.xlane.f32.xlu0 %v297_v40  ;;  %v302_v46 = vshll.u32 %v301_v57, 16 }
 0x20c   :  { %v924_v45 = vpop.xlane.xlu0 %339  ;;  %v926_v53 = vpop.xlane.xlu1 %324 }
 0x20d   :  { %vm326_vm12 = vcmp.eq.f32.partialorder %v856_v10, %v926_v53  ;;  %vm341_vm15 = vcmp.eq.f32.partialorder %v854_v9, %v924_v45 }
 0x20e   :  { %v327_v60 = vsel %vm326_vm12, %v322_v54, inf  ;;  %v342_v58 = vsel %vm341_vm15, %v337_v4, inf  ;;  %v287_v54 = vshll.u32 %v286_v34, 16 }
 0x20f   :  { %328 = vmin.xlane.f32.xlu0 %v327_v60 }
 0x210   :  { %v934_v56 = vpop.xlane.xlu0 %369  ;;  %v936_v59 = vpop.xlane.xlu1 %354 }
 0x211   :  { %vm356_vm14 = vcmp.eq.f32.partialorder %v866_v15, %v936_v59  ;;  %vm371_vm2 = vcmp.eq.f32.partialorder %v864_v14, %v934_v56 }
 0x212   :  { %v357_v2 = vsel %vm356_vm14, %v352_v63, inf  ;;  %v372_v12 = vsel %vm371_vm2, %v367_v11, inf  ;;  %v346_v11 = vcvt.f32.s32 %v924_v45 }
 0x213   :  { %313 = vmin.xlane.f32.xlu0 %v312_v1  ;;  %358 = vmin.xlane.f32.xlu1 %v357_v2  ;;  %v331_v1 = vcvt.f32.s32 %v926_v53 }
 0x214   :  { %v210_v61 = vpop.xlane.xlu0 %209  ;;  %v944_v3 = vpop.xlane.xlu1 %384 }
 0x215   :  { %644 = vrcp.f32 %v210_v61  ;;  %vm386_vm0 = vcmp.eq.f32.partialorder %v877_v23, %v944_v3  ;;  %v361_v61 = vcvt.f32.s32 %v936_v59  ;;  %v317_v59 = vshll.u32 %v316_v50, 16 }
 0x216   :  { %v387_v8 = vsel %vm386_vm0, %v382_v5, inf  ;;  %v332_v5 = vshll.u32 %v331_v1, 16 }
 0x217   :  { %343 = vmin.xlane.f32.xlu0 %v342_v58  ;;  %388 = vmin.xlane.f32.xlu1 %v387_v8 }
 0x218   :  { %v222_v10 = vpop.xlane.xlu0 %221  ;;  %v213_v9 = vpop.xlane.xlu1 %212 }
 0x219   :  { %646 = vrcp.f32 %v222_v10 }
 0x21a   :  { %648 = vrcp.f32 %v213_v9 }
 0x21b   :  { %373 = vmin.xlane.f32.xlu0 %v372_v12  ;;  %v362_v12 = vshll.u32 %v361_v61, 16 }
 0x21c   :  { %v216_v13 = vpop.xlane.xlu0 %215  ;;  %v225_v6 = vpop.xlane.xlu1 %224 }
 0x21d   :  { %650 = vrcp.f32 %v216_v13  ;;  %v391_v13 = vcvt.f32.s32 %v944_v3 }
 0x21e   :  { %652 = vrcp.f32 %v225_v6 }
 0x21f   :  { %v645_v15 = vpop.eup %644 }
 0x220   :  { %v240_v16 = vmul.f32 %v645_v15, %v873_v21  ;;  %v219_v17 = vpop.xlane.xlu1 %218 }
 0x221   :  { %654 = vrcp.f32 %v219_v17 }
 0x222   :  { %248 = vst.msk [vmem:[%s1091_s2] sm:$0xff] %vm159_vm1, %v240_v16  ;;  %v477_v26 = vsel %vm159_vm1, %v240_v16, 0.0 }
 0x223   :  { %v647_v14 = vpop.eup %646 }
 0x224   :  { %v649_v18 = vpop.eup %648  ;;  %v244_v19 = vmul.f32 %v647_v14, %v883_v27  ;;  %v228_v23 = vpop.xlane.xlu1 %227 }
 0x225   :  { %v241_v24 = vmul.f32 %v649_v18, %v879_v25  ;;  %656 = vrcp.f32 %v228_v23  ;;  %v347_v23 = vshll.u32 %v346_v11, 16 }
 0x226   :  { %252 = vst.msk [vmem:[%s1091_s2 + $0x20] sm:$0xff] %vm159_vm1, %v244_v19  ;;  %v484_v42 = vsel %vm159_vm1, %v244_v19, 0.0 }
 0x227   :  { %v651_v21 = vpop.eup %650  ;;  %249 = vst.msk [vmem:[%s1091_s2 + $0x8] sm:$0xff] %vm159_vm1, %v241_v24  ;;  %v478_v28 = vsel %vm159_vm1, %v241_v24, 0.0  ;;  %v376_v24 = vcvt.f32.s32 %v934_v56 }
 0x228   :  { %v653_v27 = vpop.eup %652  ;;  %v479_v29 = vadd.f32 %v478_v28, %v477_v26  ;;  %v242_v25 = vmul.f32 %v651_v21, %v886_v22 }
 0x229   :  { %v245_v32 = vmul.f32 %v653_v27, %v892_v30 }
 0x22a   :  { %250 = vst.msk [vmem:[%s1091_s2 + $0x10] sm:$0xff] %vm159_vm1, %v242_v25  ;;  %v480_v33 = vsel %vm159_vm1, %v242_v25, 0.0 }
 0x22b   :  { %v655_v36 = vpop.eup %654  ;;  %v481_v38 = vadd.f32 %v480_v33, %v479_v29  ;;  %253 = vst.msk [vmem:[%s1091_s2 + $0x28] sm:$0xff] %vm159_vm1, %v245_v32 }
 0x22c   :  { %v243_v39 = vmul.f32 %v655_v36, %v898_v35  ;;  %v486_v35 = vsel %vm159_vm1, %v245_v32, 0.0 }
 0x22e   :  { %251 = vst.msk [vmem:[%s1091_s2 + $0x18] sm:$0xff] %vm159_vm1, %v243_v39  ;;  %v482_v22 = vsel %vm159_vm1, %v243_v39, 0.0  ;;  %v377_v39 = vshll.u32 %v376_v24, 16 }
 0x22f   :  { %v657_v30 = vpop.eup %656  ;;  %v483_v41 = vadd.f32 %v482_v22, %v481_v38 }
 0x230   :  { %v246_v44 = vmul.f32 %v657_v30, %v902_v37 }
 0x231   :  { %v485_v47 = vadd.f32 %v484_v42, %v483_v41 }
 0x232   :  { %254 = vst.msk [vmem:[%s1091_s2 + $0x30] sm:$0xff] %vm159_vm1, %v246_v44  ;;  %v488_v20 = vsel %vm159_vm1, %v246_v44, 0.0 }
 0x233   :  { %v487_v48 = vadd.f32 %v486_v35, %v485_v47 }
 0x235   :  { %v489_v51 = vadd.f32 %v488_v20, %v487_v48 }
 0x294   :  { %v284_v40 = vpop.xlane.xlu1 %283 }
 0x295   :  { %v285_v55 = vcvt.f32.s32 %v284_v40 }
 0x297   :  { %v288_v37 = vadd.s32 %v287_v54, %v285_v55 }
 0x298   :  { %v231_v60 = vpop.xlane.xlu1 %230  ;;  %v299_v0 = vpop.xlane.xlu0 %298 }
 0x299   :  { %vm394_vm3 = vcmp.eq.s32.totalorder %v805_v31, %v288_v37  ;;  %658 = vrcp.f32 %v231_v60  ;;  %v300_v43 = vcvt.f32.s32 %v299_v0 }
 0x29a   :  { %v573_v63 = vsel %vm394_vm3, 1.0, %v708_v62 }
 0x29b   :  { %418 = vst.msk [vmem:[%s1092_s3] sm:$0xff] %vm159_vm1, %v573_v63  ;;  %v303_v2 = vadd.s32 %v302_v46, %v300_v43  ;;  %v506_v8 = vsel %vm159_vm1, %v573_v63, 0.0 }
 0x29c   :  { %v329_v4 = vpop.xlane.xlu0 %328 }
 0x29d   :  { %vm395_vm4 = vcmp.eq.s32.totalorder %v805_v31, %v303_v2  ;;  %v330_v58 = vcvt.f32.s32 %v329_v4 }
 0x29e   :  { %v574_v7 = vsel %vm395_vm4, 1.0, %v708_v62 }
 0x29f   :  { %419 = vst.msk [vmem:[%s1092_s3 + $0x8] sm:$0xff] %vm159_vm1, %v574_v7  ;;  %v507_v53 = vsel %vm159_vm1, %v574_v7, 0.0  ;;  %v333_v52 = vadd.s32 %v332_v5, %v330_v58 }
 0x2a0   :  { %v508_v10 = vadd.f32 %v507_v53, %v506_v8  ;;  %v314_v6 = vpop.xlane.xlu0 %313  ;;  %v359_v15 = vpop.xlane.xlu1 %358 }
 0x2a1   :  { %vm397_vm5 = vcmp.eq.s32.totalorder %v805_v31, %v333_v52  ;;  %v315_v16 = vcvt.f32.s32 %v314_v6  ;;  %v360_v17 = vcvt.f32.s32 %v359_v15 }
 0x2a2   :  { %v576_v18 = vsel %vm397_vm5, 1.0, %v708_v62 }
 0x2a3   :  { %v659_v9 = vpop.eup %658  ;;  %421 = vst.msk [vmem:[%s1092_s3 + $0x18] sm:$0xff] %vm159_vm1, %v576_v18  ;;  %v318_v19 = vadd.s32 %v317_v59, %v315_v16  ;;  %v363_v45 = vadd.s32 %v362_v12, %v360_v17  ;;  %v511_v42 = vsel %vm159_vm1, %v576_v18, 0.0 }
 0x2a4   :  { %v247_v14 = vmul.f32 %v659_v9, %v913_v49  ;;  %v392_v49 = vshll.u32 %v391_v13, 16  ;;  %v344_v21 = vpop.xlane.xlu0 %343  ;;  %v389_v26 = vpop.xlane.xlu1 %388 }
 0x2a5   :  { %vm396_vm6 = vcmp.eq.s32.totalorder %v805_v31, %v318_v19  ;;  %vm399_vm7 = vcmp.eq.s32.totalorder %v805_v31, %v363_v45  ;;  %v345_v27 = vcvt.f32.s32 %v344_v21  ;;  %v390_v29 = vcvt.f32.s32 %v389_v26 }
 0x2a6   :  { %255 = vst.msk [vmem:[%s1091_s2 + $0x38] sm:$0xff] %vm159_vm1, %v247_v14  ;;  %v490_v3 = vsel %vm159_vm1, %v247_v14, 0.0  ;;  %v575_v25 = vsel %vm396_vm6, 1.0, %v708_v62  ;;  %v578_v32 = vsel %vm399_vm7, 1.0, %v708_v62 }
 0x2a7   :  { %v491_v28 = vadd.f32 %v490_v3, %v489_v51  ;;  %420 = vst.msk [vmem:[%s1092_s3 + $0x10] sm:$0xff] %vm159_vm1, %v575_v25  ;;  %v509_v56 = vsel %vm159_vm1, %v575_v25, 0.0  ;;  %423 = vst.msk [vmem:[%s1092_s3 + $0x28] sm:$0xff] %vm159_vm1, %v578_v32  ;;  %v348_v36 = vadd.s32 %v347_v23, %v345_v27  ;;  %v393_v38 = vadd.s32 %v392_v49, %v390_v29 }
 0x2a8   :  { %v510_v22 = vadd.f32 %v509_v56, %v508_v10  ;;  %v374_v30 = vpop.xlane.xlu0 %373  ;;  %v515_v55 = vsel %vm159_vm1, %v578_v32, 0.0 }
 0x2a9   :  { %v492_v33 = vrot.slane %v491_v28, 4  ;;  %vm398_vm8 = vcmp.eq.s32.totalorder %v805_v31, %v348_v36  ;;  %vm401_vm9 = vcmp.eq.s32.totalorder %v805_v31, %v393_v38  ;;  %v375_v44 = vcvt.f32.s32 %v374_v30 }
 0x2aa   :  { %v577_v47 = vsel %vm398_vm8, 1.0, %v708_v62  ;;  %v512_v35 = vadd.f32 %v511_v42, %v510_v22  ;;  %v580_v48 = vsel %vm401_vm9, 1.0, %v708_v62 }
 0x2ab   :  { %v493_v41 = vadd.f32 %v492_v33, %v491_v28  ;;  %422 = vst.msk [vmem:[%s1092_s3 + $0x20] sm:$0xff] %vm159_vm1, %v577_v47  ;;  %v513_v51 = vsel %vm159_vm1, %v577_v47, 0.0  ;;  %425 = vst.msk [vmem:[%s1092_s3 + $0x38] sm:$0xff] %vm159_vm1, %v580_v48  ;;  %v378_v34 = vadd.s32 %v377_v39, %v375_v44  ;;  %v519_v43 = vsel %vm159_vm1, %v580_v48, 0.0 }
 0x2ac   :  { %v514_v40 = vadd.f32 %v513_v51, %v512_v35 }
 0x2ad   :  { %v494_v20 = vrot.slane %v493_v41, 2  ;;  %vm400_vm10 = vcmp.eq.s32.totalorder %v805_v31, %v378_v34 }
 0x2ae   :  { %v579_v57 = vsel %vm400_vm10, 1.0, %v708_v62  ;;  %v516_v37 = vadd.f32 %v515_v55, %v514_v40 }
 0x2af   :  { %v495_v54 = vadd.f32 %v494_v20, %v493_v41  ;;  %424 = vst.msk [vmem:[%s1092_s3 + $0x30] sm:$0xff] %vm159_vm1, %v579_v57  ;;  %v517_v63 = vsel %vm159_vm1, %v579_v57, 0.0 }
 0x2b0   :  { %v518_v0 = vadd.f32 %v517_v63, %v516_v37 }
 0x2b1   :  { %v496_v60 = vrot.slane %v495_v54, 1 }
 0x2b2   :  { %v520_v1 = vadd.f32 %v519_v43, %v518_v0 }
 0x2b3   :  { %v497_v46 = vadd.f32 %v496_v60, %v495_v54 }
 0x2b5   :  { %527 = vst.msk [vmem:[#allocation2] sm:$0xff] %vm159_vm1, %v497_v46 }
 0x2b6   :  { %671 = shalt.err (!%p668_p4)
}
 0x2b7   :  { %s672_s3 = scalar_lea.hbm %s1093_s4, 128 }
 0x2b8   :  { %p673_p5 = scmp.ne.s32.totalorder %s1093_s4, %s672_s3  ;;  %p676_p6 = scmp.lt.u32.totalorder %s672_s3, %s1093_s4 }
 0x2ba   :  { %p678_p7 = pnand %p676_p6, %p673_p5 }
 0x2bc   :  { %681 = shalt.err (!%p678_p7)
}
 0x2bd   :  { %542 = dma.vmem_to_hbm [thread:$0]  %s540_s18, 128, %s1093_s4, [#allocation3]   ;;  %v521_v31 = vrot.slane %v520_v1, 4 }
 0x2be   :  { %s710_s1 = smov [#allocation4]  }
 0x2bf   :  { %v522_v62 = vadd.f32 %v521_v31, %v520_v1  ;;  %s549_s30 = sshll.u32 %s710_s1, 4  ;;  %s550_s30 = int_to_ptr.vmem [resolvable:$true] %s549_s30 }
 0x2c0   :  { %s682_s6 = scalar_lea.vmem %s550_s30, 128  ;;  %p687_p9 = scmp.lt.s32.totalorder %s550_s30, %s550_s30 }
 0x2c1   :  { %v523_v2 = vrot.slane %v522_v62, 2  ;;  %p683_p8 = scmp.ne.s32.totalorder %s550_s30, %s682_s6  ;;  %p688_p10 = scmp.lt.s32.totalorder %s682_s6, %s682_s6 }
 0x2c3   :  { %v524_v50 = vadd.f32 %v523_v2, %v522_v62  ;;  %p689_p11 = por %p688_p10, %p687_p9 }
 0x2c5   :  { %v525_v61 = vrot.slane %v524_v50, 1  ;;  %p690_p12 = pnand %p689_p11, %p683_p8 }
 0x2c7   :  { %v526_v4 = vadd.f32 %v525_v61, %v524_v50 }
 0x2c9   :  { %528 = vst.msk [vmem:[#allocation4] sm:$0xff] %vm159_vm1, %v526_v4 }
 0x2ca   :  { %693 = shalt.err (!%p690_p12)
}
 0x2cb   :  { %s694_s8 = scalar_lea.hbm %s1094_s5, 128 }
 0x2cc   :  { %p695_p13 = scmp.ne.s32.totalorder %s1094_s5, %s694_s8  ;;  %p698_p0 = scmp.lt.u32.totalorder %s694_s8, %s1094_s5 }
 0x2ce   :  { %p700_p1 = pnand %p698_p0, %p695_p13 }
 0x2d0   :  { %703 = shalt.err (!%p700_p1)
}
 0x2d1   :  { %552 = dma.vmem_to_hbm [thread:$0]  %s550_s30, 128, %s1094_s5, [#allocation5]  }
 0x2d2   :  { %704 = dma.done.wait [#allocation3], 128  }
 0x2d3   :  { %705 = vsyncadd [#allocation3], 4294967168 }
 0x2d4   :  { %706 = dma.done.wait [#allocation5], 128  }
 0x2d5   :  { %707 = vsyncadd [#allocation5], 4294967168 }
 0x2d6   :  { %563 = vsyncpa [#allocation3], 1 }
 0x2d7   :  { %564 = vsyncpa [#allocation5], 1 }

</bundles_post_ra>
